<compile_context>
chip_gen: v5e
topology: v5e:2x2
jax: 0.10.0
libtpu: 0.0.40
codegen_flags: <defaults>
</compile_context>

<pallas_src>
import jax
import jax.numpy as jnp
from jax import lax
from jax.experimental import pallas as pl
from jax.experimental.pallas import tpu as pltpu

CLS_ID = 101   # bert-base-uncased [CLS]
SEP_ID = 102   # bert-base-uncased [SEP]
PAD_ID = 0     # bert-base-uncased [PAD]
MAX_LENGTH = 256

_MAX_BLOCK_B = 1024   # ~1024*256*(4+1)*2buf ≈ 2.5 MiB — safe even on v7x VMEM


def _tokenizer_kernel(tok_ref, len_ref, ids_ref, mask_ref):
    """Build input_ids / attention_mask for one batch tile.

    tok_ref : [bB, L] int32 -- token ids already shifted right by one column
              (column 0 is a zero placeholder for [CLS]; column j holds raw
              content token j-1).
    len_ref : [bB, 1] int32 -- true (untruncated) content lengths.
    ids_ref : [bB, L] int32 output.
    mask_ref: [bB, L] int8  output.
    """
    bB, L = ids_ref.shape

    tok = tok_ref[...]                                         # [bB, L]

    # Truncated content length per row (HF truncation=True, max_length=256
    # => at most 254 content tokens; also clamp to the kernel width).
    n = jnp.minimum(len_ref[...], jnp.int32(min(MAX_LENGTH - 2, L - 2)))

    pos = lax.broadcasted_iota(jnp.int32, (bB, L), 1)          # [bB, L]

    # input_ids: [CLS] tok_1 ... tok_n [SEP] PAD ... PAD
    ids = jnp.where(
        pos == 0,
        jnp.int32(CLS_ID),
        jnp.where(
            pos <= n,
            tok,
            jnp.where(pos == n + 1, jnp.int32(SEP_ID), jnp.int32(PAD_ID)),
        ),
    )
    ids_ref[...] = ids

    # attention_mask: 1 over [CLS] .. [SEP], 0 over padding (int8 output).
    mask_ref[...] = (pos <= n + 1).astype(jnp.int8)


def tokenizer_forward(token_ids, lengths, max_length=MAX_LENGTH):
    """JAX/Pallas equivalent of Tokenizer.forward (mode='sig').

    token_ids : [B, R] int32 dense ragged batch of pre-tokenized WordPiece ids
                (row b valid in columns [0, lengths[b])).
    lengths   : python list / 1-D array of ints, true content lengths per row.
    Returns dict(input_ids[int32], attention_mask[int8], token_type_ids[int32]),
    each [B, L] with L = min(max(lengths), max_length - 2) + 2
    (padding='longest', truncation=True semantics).
    """
    token_ids = jnp.asarray(token_ids, jnp.int32)
    B, R = token_ids.shape
    lens_py = [int(l) for l in lengths]                      # concrete lengths
    L_true = min(max(lens_py), max_length - 2) + 2           # HF padded length
    L_pad = ((L_true + 127) // 128) * 128                    # lane-dense width

    # Single jnp.pad does BOTH jobs: shift content right by one column (room
    # for [CLS]) and pad to the lane-dense kernel width.  This is the same
    # layout pass we needed anyway, so no extra HBM traffic.
    content = token_ids[:, : min(R, L_pad - 1)]
    tok = jnp.pad(content, ((0, 0), (1, L_pad - 1 - content.shape[1])),
                  constant_values=PAD_ID)
    lens_arr = jnp.asarray(lens_py, jnp.int32).reshape(B, 1)

    # Batch tiling: block_B must be a multiple of 8 or equal to B.
    # min(B, 1024) satisfies this (1024 % 8 == 0); partial tail blocks are
    # handled by Pallas (padded reads, masked writes).
    block_B = min(B, _MAX_BLOCK_B)
    grid = (pl.cdiv(B, block_B),)

    row_spec = pl.BlockSpec((block_B, L_pad), lambda i: (i, 0))
    # NOTE: lengths feed a vectorized per-row compare, so a (block_B, 1) VMEM
    # block is the natural home (SMEM would force a scalar per-row loop).
    len_spec = pl.BlockSpec((block_B, 1), lambda i: (i, 0))

    ids, mask = pl.pallas_call(
        _tokenizer_kernel,
        out_shape=(
            jax.ShapeDtypeStruct((B, L_pad), jnp.int32),
            jax.ShapeDtypeStruct((B, L_pad), jnp.int8),
        ),
        grid=grid,
        in_specs=[row_spec, len_spec],
        out_specs=(row_spec, row_spec),
        compiler_params=pltpu.CompilerParams(
            dimension_semantics=("parallel",)),
    )(tok, lens_arr)

    # Crop back to the batch-longest length (HF padding='longest' semantics).
    ids = ids[:, :L_true]
    mask = mask[:, :L_true]
    # token_type_ids is identically zero in single-sentence ('sig') mode; no
    # need to burn an output DMA stream on it.
    # TODO(synk): mode='double_sentences' (sentence-pair segment ids) not implemented.
    ttype = jnp.zeros((B, L_true), jnp.int32)

    return {"input_ids": ids, "attention_mask": mask, "token_type_ids": ttype}


if __name__ == "__main__":
    # Small deterministic example: batch of 2 "sentences", raw seq len <= 8.
    key = jax.random.PRNGKey(0)
    B, R = 2, 8
    lengths = [5, 8]  # ragged content lengths per sentence
    token_ids = jax.random.randint(key, (B, R), 1000, 30000, dtype=jnp.int32)
    # zero out the invalid tail of each ragged row (cosmetic; kernel masks it anyway)
    col = jnp.arange(R)[None, :]
    token_ids = jnp.where(col < jnp.asarray(lengths)[:, None], token_ids, 0)

    out = tokenizer_forward(token_ids, lengths)
    jax.block_until_ready(out)

    # Light sanity checks against BertTokenizer semantics.
    ids = jax.device_get(out["input_ids"])
    mask = jax.device_get(out["attention_mask"])
    tok_np = jax.device_get(token_ids)
    L = min(max(lengths), MAX_LENGTH - 2) + 2
    assert ids.shape == (B, L) and mask.shape == (B, L)
    assert ids[0, 0] == CLS_ID and ids[1, 0] == CLS_ID
    assert ids[0, lengths[0] + 1] == SEP_ID and ids[1, lengths[1] + 1] == SEP_ID
    # content tokens are preserved, shifted right by one for [CLS]
    assert (ids[0, 1:1 + lengths[0]] == tok_np[0, :lengths[0]]).all()
    assert (ids[1, 1:1 + lengths[1]] == tok_np[1, :lengths[1]]).all()
    assert int(mask[0].sum()) == lengths[0] + 2 and int(mask[1].sum()) == lengths[1] + 2
    assert int(out["token_type_ids"].sum()) == 0

    print("KERNEL_OK")
</pallas_src>

<mosaic_0001>
module attributes {stable_mosaic.version = 11 : i64} {
  func.func @_tokenizer_kernel(%arg0: i32, %arg1: memref<2x128xi32, #tpu.memory_space<vmem>>, %arg2: memref<2x1xi32, #tpu.memory_space<vmem>>, %arg3: memref<2x128xi32, #tpu.memory_space<vmem>>, %arg4: memref<2x128xi8, #tpu.memory_space<vmem>>) attributes {dimension_semantics = [#tpu.dimension_semantics<parallel>], iteration_bounds = array<i64: 1>, scalar_prefetch = 0 : i64, scratch_operands = 0 : i64, tpu.core_type = #tpu.core_type<tc>, window_params = [{transform_indices = @transform_0, window_bounds = array<i64: 2, 128>}, {transform_indices = @transform_1, window_bounds = array<i64: 2, 1>}, {transform_indices = @transform_2, window_bounds = array<i64: 2, 128>}, {transform_indices = @transform_3, window_bounds = array<i64: 2, 128>}]} {
    %c0 = arith.constant 0 : index
    %c0_0 = arith.constant 0 : index
    %0 = vector.load %arg1[%c0, %c0_0] : memref<2x128xi32, #tpu.memory_space<vmem>>, vector<2x128xi32>
    %c0_1 = arith.constant 0 : index
    %c0_2 = arith.constant 0 : index
    %1 = vector.load %arg2[%c0_1, %c0_2] : memref<2x1xi32, #tpu.memory_space<vmem>>, vector<2x1xi32>
    %c126_i32 = arith.constant 126 : i32
    %2 = vector.broadcast %c126_i32 : i32 to vector<2x1xi32>
    %3 = arith.minsi %1, %2 : vector<2x1xi32>
    %4 = tpu.iota {dimensions = array<i32: 1>} : vector<2x128xi32>
    %c0_i32 = arith.constant 0 : i32
    %5 = vector.broadcast %c0_i32 : i32 to vector<2x128xi32>
    %6 = arith.cmpi eq, %4, %5 : vector<2x128xi32>
    %7 = vector.broadcast %3 : vector<2x1xi32> to vector<2x128xi32>
    %8 = arith.cmpi sle, %4, %7 : vector<2x128xi32>
    %c1_i32 = arith.constant 1 : i32
    %9 = vector.broadcast %c1_i32 : i32 to vector<2x1xi32>
    %10 = arith.addi %3, %9 : vector<2x1xi32>
    %11 = vector.broadcast %10 : vector<2x1xi32> to vector<2x128xi32>
    %12 = arith.cmpi eq, %4, %11 : vector<2x128xi32>
    %c102_i32 = arith.constant 102 : i32
    %c0_i32_3 = arith.constant 0 : i32
    %13 = vector.broadcast %c102_i32 : i32 to vector<2x128xi32>
    %14 = vector.broadcast %c0_i32_3 : i32 to vector<2x128xi32>
    %15 = arith.select %12, %13, %14 : vector<2x128xi1>, vector<2x128xi32>
    %16 = arith.select %8, %0, %15 : vector<2x128xi1>, vector<2x128xi32>
    %c101_i32 = arith.constant 101 : i32
    %17 = vector.broadcast %c101_i32 : i32 to vector<2x128xi32>
    %18 = arith.select %6, %17, %16 : vector<2x128xi1>, vector<2x128xi32>
    %c0_4 = arith.constant 0 : index
    %c0_5 = arith.constant 0 : index
    %19 = vector.load %arg3[%c0_4, %c0_5] : memref<2x128xi32, #tpu.memory_space<vmem>>, vector<2x128xi32>
    tpu.vector_store %arg3[%c0_4, %c0_5], %18 {strides = array<i32>} : memref<2x128xi32, #tpu.memory_space<vmem>>, vector<2x128xi32>,
    %c1_i32_6 = arith.constant 1 : i32
    %20 = vector.broadcast %c1_i32_6 : i32 to vector<2x1xi32>
    %21 = arith.addi %3, %20 : vector<2x1xi32>
    %22 = vector.broadcast %21 : vector<2x1xi32> to vector<2x128xi32>
    %23 = arith.cmpi sle, %4, %22 : vector<2x128xi32>
    %24 = arith.extui %23 : vector<2x128xi1> to vector<2x128xi8>
    %c0_7 = arith.constant 0 : index
    %c0_8 = arith.constant 0 : index
    %25 = vector.load %arg4[%c0_7, %c0_8] : memref<2x128xi8, #tpu.memory_space<vmem>>, vector<2x128xi8>
    tpu.vector_store %arg4[%c0_7, %c0_8], %24 {strides = array<i32>} : memref<2x128xi8, #tpu.memory_space<vmem>>, vector<2x128xi8>,
    return
  }
  func.func @transform_0(%arg0: i32) -> (i32, i32) {
    %c0_i32 = arith.constant 0 : i32
    %c0_i32_0 = arith.constant 0 : i32
    return %arg0, %c0_i32 : i32, i32
  }
  func.func @transform_1(%arg0: i32) -> (i32, i32) {
    %c0_i32 = arith.constant 0 : i32
    %c0_i32_0 = arith.constant 0 : i32
    return %arg0, %c0_i32 : i32, i32
  }
  func.func @transform_2(%arg0: i32) -> (i32, i32) {
    %c0_i32 = arith.constant 0 : i32
    %c0_i32_0 = arith.constant 0 : i32
    return %arg0, %c0_i32 : i32, i32
  }
  func.func @transform_3(%arg0: i32) -> (i32, i32) {
    %c0_i32 = arith.constant 0 : i32
    %c0_i32_0 = arith.constant 0 : i32
    return %arg0, %c0_i32 : i32, i32
  }
}

</mosaic_0001>

<bundles_post_ra>
// kernel: tpu_custom_call.1
= control target key start
LH: loop header
LB: loop body
LE: loop exit
PB: predicated region body
PF: predicated region fallthrough
CT: control target
= control target key end

     0   :  { %9 = vsyncpa [#allocation3], 0  ;;  %s179_s0 = inlined_call_operand.vmem [shape: s32[2,128], index: 0, kind: input, shape index: {}]   ;;  %s180_s1 = inlined_call_operand.vmem [shape: s32[2,1], index: 1, kind: input, shape index: {}]   ;;  %s181_s2 = inlined_call_operand.hbm [shape: s32[2,128], index: 2, kind: output, shape index: {0}]   ;;  %s182_s3 = inlined_call_operand.hbm [shape: s8[2,128], index: 3, kind: output, shape index: {1}]  }
   0x1   :  { %v18_v0 = vld [vmem:[%s180_s1] sm:$0x3] }
   0x2   :  { %10 = vsyncpa [#allocation5], 0  ;;  %v138_v1 = vmov 0   ;;  %vm19_vm0 = vcmp.lt.s32.totalorder %v18_v0, 126  ;;  %v21_v4 = vlaneseq  ;;  %vm44_vm3 = vcmask 1040384   ;;  %s139_s14 = smov [#allocation4]  }
   0x3   :  { %85 = vset.pattern.permute.xlu0 %v138_v1  ;;  %v20_v2 = vsel %vm19_vm0, %v18_v0, 126  ;;  %vm45_vm4 = vsmask.f32 256  ;;  %s66_s15 = sshll.u32 %s139_s14, 4  ;;  %s68_s17 = sshll.u32 %s182_s3, 4  ;;  %s67_s15 = int_to_ptr.vmem [resolvable:$true] %s66_s15  ;;  %s69_s17 = int_to_ptr.hbm [resolvable:$true] %s68_s17 }
   0x4   :  { %v28_v3 = vadd.s32 1, %v20_v2  ;;  %v22_v5 = vand.u32 127, %v21_v4  ;;  %vm167_vm5 = vmand %vm44_vm3, %vm45_vm4  ;;  %v47_v10 = vld [vmem:[#allocation4] sm:$0x1]  ;;  %s140_s18 = smov [#allocation2]   ;;  %s57_s22 = sshll.u32 %s181_s2, 4  ;;  %s58_s22 = int_to_ptr.hbm [resolvable:$true] %s57_s22 }
   0x5   :  { %s55_s19 = sshll.u32 %s140_s18, 4  ;;  %v17_v12 = vld [vmem:[%s179_s0] sm:$0x3]  ;;  %s56_s19 = int_to_ptr.vmem [resolvable:$true] %s55_s19 }
   0x6   :  { %30 = vperm.xlu0 %85, %v28_v3   ;;  %vm23_vm8 = vcmp.eq.s32.totalorder %v22_v5, 0 }
   0xe   :  { %25 = vperm.xlu0 %85, %v20_v2  }
  0x78   :  { %v31_v6 = vpop.permute.xlu0 %30 }
  0x79   :  { %vm37_vm1 = vcmp.le.s32.totalorder %v22_v5, %v31_v6  ;;  %vm32_vm6 = vcmp.eq.s32.totalorder %v22_v5, %v31_v6 }
  0x7a   :  { %vm38_vm2 = vmpackc.low %vm37_vm1, %vm37_vm1  ;;  %v33_v15 = vsel %vm32_vm6, 102, %v138_v1 }
  0x7b   :  { %v39_v7 = vsel %vm38_vm2, 16711935, %v138_v1 }
  0x7c   :  { %v41_v8 = vpack.c.b8 %v39_v7, %v39_v7 }
  0x7e   :  { %vm42_vm7 = vnez %v41_v8 }
  0x7f   :  { %v43_v11 = vsel %vm42_vm7, 16843009, %v138_v1 }
  0x80   :  { %v26_v13 = vpop.permute.xlu0 %25  ;;  %v48_v14 = vsel %vm167_vm5, %v43_v11, %v47_v10 }
  0x81   :  { %vm27_vm9 = vcmp.le.s32.totalorder %v22_v5, %v26_v13  ;;  %49 = vst [vmem:[#allocation4] sm:$0x1] %v48_v14 }
  0x82   :  { %v34_v16 = vsel %vm27_vm9, %v17_v12, %v33_v15  ;;  %71 = dma.vmem_to_hbm [thread:$0]  %s67_s15, 16, %s69_s17, [#allocation5]  }
  0x83   :  { %v35_v17 = vsel %vm23_vm8, 101, %v34_v16 }
  0x84   :  { %36 = vst [vmem:[#allocation2] sm:$0x3] %v35_v17 }
  0x85   :  { %60 = dma.vmem_to_hbm [thread:$0]  %s56_s19, 32, %s58_s22, [#allocation3]  }
  0x86   :  { %134 = dma.done.wait [#allocation3], 32  }
  0x87   :  { %135 = vsyncadd [#allocation3], 4294967264 }
  0x88   :  { %136 = dma.done.wait [#allocation5], 16  }
  0x89   :  { %137 = vsyncadd [#allocation5], 4294967280 }
  0x8a   :  { %80 = vsyncpa [#allocation3], 1 }
  0x8b   :  { %81 = vsyncpa [#allocation5], 1 }

</bundles_post_ra>
